<compile_context>
chip_gen: v7x
topology: tpu7x:2x2x1
jax: 0.10.0
libtpu: 0.0.40
codegen_flags: <defaults>
</compile_context>

<pallas_src>
import jax
import jax.numpy as jnp
from jax import lax
from jax.experimental import pallas as pl
from jax.experimental.pallas import tpu as pltpu


# ----------------------------------------------------------------------------
# Deterministic parameter init (orthogonal weights, zero biases)
# ----------------------------------------------------------------------------
def _orthogonal(key, shape, gain=1.0):
    rows, cols = shape
    a = jax.random.normal(key, (max(rows, cols), min(rows, cols)), jnp.float32)
    q, r = jnp.linalg.qr(a)
    d = jnp.sign(jnp.diag(r))
    d = jnp.where(d == 0, 1.0, d)
    q = q * d[None, :]
    if rows < cols:
        q = q.T
    return (gain * q[:rows, :cols]).astype(jnp.float32)


# ----------------------------------------------------------------------------
# Pallas kernel: one seq_block time chunk per grid step.
# ----------------------------------------------------------------------------
def rnn_qnet_kernel(x_ref, keep_ref, h0_ref,
                    w_ih_t_ref, w_hh_t_ref, b_ih_ref, b_hh_ref,
                    w0_t_ref, b0_ref, w1_t_ref, b1_ref, w2_t_ref, b2_ref,
                    gru_ref, q_ref, h_last_ref, h_carry):
    N, H = h0_ref.shape
    TL = x_ref.shape[0] // N          # timesteps in this chunk (static)

    # Initialise the carried hidden state from h0 on the first chunk.
    @pl.when(pl.program_id(0) == 0)
    def _():
        h_carry[...] = h0_ref[...]

    # ---- Hoisted input-gate matmul for the whole chunk (no h dependence) ----
    gi = jnp.dot(x_ref[...], w_ih_t_ref[...],
                 preferred_element_type=jnp.float32) + b_ih_ref[...]
    gi_r, gi_z, gi_n = gi[:, :H], gi[:, H:2 * H], gi[:, 2 * H:]

    w_hh_t = w_hh_t_ref[...]
    b_hh = b_hh_ref[...]
    keep = keep_ref[...]              # (TL*N, 1) = 1 - dones, time-major

    # ---- Serial GRU recurrence, statically unrolled over the chunk ----------
    h = h_carry[...]
    for t in range(TL):
        r0, r1 = t * N, (t + 1) * N
        h = h * keep[r0:r1]           # reset hidden state where done == 1
        gh = jnp.dot(h, w_hh_t, preferred_element_type=jnp.float32) + b_hh
        r = jax.nn.sigmoid(gi_r[r0:r1] + gh[:, :H])
        z = jax.nn.sigmoid(gi_z[r0:r1] + gh[:, H:2 * H])
        n = jnp.tanh(gi_n[r0:r1] + r * gh[:, 2 * H:])
        h = (1.0 - z) * n + z * h
        gru_ref[r0:r1, :] = h
    h_carry[...] = h
    h_last_ref[...] = h

    # ---- Hoisted Q-head: one set of MXU-shaped matmuls per chunk ------------
    a = jnp.maximum(gru_ref[...], 0.0)
    a = jnp.maximum(jnp.dot(a, w0_t_ref[...],
                            preferred_element_type=jnp.float32) + b0_ref[...], 0.0)
    a = jnp.maximum(jnp.dot(a, w1_t_ref[...],
                            preferred_element_type=jnp.float32) + b1_ref[...], 0.0)
    q_ref[...] = jnp.dot(a, w2_t_ref[...],
                         preferred_element_type=jnp.float32) + b2_ref[...]


def _pick_seq_block(L, N, target=16):
    best = L                           # full-sequence block is always legal
    for b in range(1, min(L, target) + 1):
        if L % b == 0 and (b * N) % 8 == 0:
            best = b
    return best


# ----------------------------------------------------------------------------
# Wrapper: PyTorch-convention in/out.
# ----------------------------------------------------------------------------
def rnn_qnetwork_forward(params, state, hidden_state, dones=None, masks=None,
                         seq_block=None):
    """state (N, L, H_in), hidden_state (1, N, H), dones (N, L)
       -> (q (N, L, A), gru_out (N, L, H), next_hidden (1, N, H))."""
    (w_ih, w_hh, b_ih, b_hh, w0, b0, w1, b1, w2, b2) = params

    if state.ndim == 2:                # unbatched convenience path
        hs = hidden_state if hidden_state.ndim == 3 else hidden_state[:, None, :]
        d = None if dones is None else dones[None]
        q, g, h = rnn_qnetwork_forward(params, state[None], hs, dones=d,
                                       masks=masks, seq_block=seq_block)
        return q[0], g[0], h[:, 0]

    N, L, H_in = state.shape
    H = w_hh.shape[1]
    A = w2.shape[0]
    A_pad = ((A + 127) // 128) * 128

    if seq_block is None:
        seq_block = _pick_seq_block(L, N)
    TL = seq_block
    assert L % TL == 0 and ((TL * N) % 8 == 0 or TL == L)

    if masks is not None and dones is None:
        hidden_state = hidden_state * masks
    h0 = hidden_state[0].astype(jnp.float32)                         # (N, H)

    if dones is None:
        keep = jnp.ones((L * N, 1), jnp.float32)
    else:
        keep = (1.0 - jnp.transpose(dones.astype(jnp.float32))).reshape(L * N, 1)

    # TODO(synk): consume batch-first (N, L, H_in) directly via BlockSpec
    # index_maps to avoid these wrapper transposes for very long sequences.
    x_flat = jnp.transpose(state, (1, 0, 2)).astype(jnp.float32).reshape(L * N, H_in)

    # Lane-dense Q output: pad the action dim up to a multiple of 128.
    w2_t_pad = jnp.zeros((H, A_pad), jnp.float32).at[:, :A].set(w2.T.astype(jnp.float32))
    b2_pad = jnp.zeros((1, A_pad), jnp.float32).at[:, :A].set(b2.astype(jnp.float32)[None, :])

    operands = (
        x_flat, keep, h0,
        w_ih.T.astype(jnp.float32), w_hh.T.astype(jnp.float32),
        b_ih.astype(jnp.float32)[None, :], b_hh.astype(jnp.float32)[None, :],
        w0.T.astype(jnp.float32), b0.astype(jnp.float32)[None, :],
        w1.T.astype(jnp.float32), b1.astype(jnp.float32)[None, :],
        w2_t_pad, b2_pad,
    )

    def stream(shape):
        return pl.BlockSpec(shape, lambda l: (l, 0))

    def resident(shape):
        return pl.BlockSpec(shape, lambda l: (0, 0))

    in_specs = [stream((TL * N, H_in)), stream((TL * N, 1)), resident((N, H))]
    in_specs += [resident(op.shape) for op in operands[3:]]

    out_shape = (
        jax.ShapeDtypeStruct((L * N, H), jnp.float32),       # gru_out (time-major, flat)
        jax.ShapeDtypeStruct((L * N, A_pad), jnp.float32),   # q (time-major, flat, padded)
        jax.ShapeDtypeStruct((N, H), jnp.float32),           # last hidden state
    )
    out_specs = (stream((TL * N, H)), stream((TL * N, A_pad)), resident((N, H)))

    flops = 2 * L * N * (H_in * 3 * H + H * 3 * H + 2 * H * H + H * A_pad) + 12 * L * N * H
    cost = pl.CostEstimate(
        flops=flops,
        transcendentals=3 * L * N * H,
        bytes_accessed=4 * (x_flat.size + keep.size + L * N * (H + A_pad)
                            + 2 * N * H + sum(int(op.size) for op in operands[3:])),
    )

    # TODO(synk): on v7x add a leading "parallel" grid axis over batch blocks to
    # use both TensorCores; on v6e/v7x the MXU inputs could be cast to bf16.
    gru_flat, q_flat, h_last = pl.pallas_call(
        rnn_qnet_kernel,
        grid=(L // TL,),
        in_specs=in_specs,
        out_specs=out_specs,
        out_shape=out_shape,
        scratch_shapes=[pltpu.VMEM((N, H), jnp.float32)],
        compiler_params=pltpu.CompilerParams(dimension_semantics=("arbitrary",)),
        cost_estimate=cost,
    )(*operands)

    gru_out = jnp.transpose(gru_flat.reshape(L, N, H), (1, 0, 2))     # (N, L, H)
    q = jnp.transpose(q_flat[:, :A].reshape(L, N, A), (1, 0, 2))      # (N, L, A)
    next_hidden_state = h_last[None]                                  # (1, N, H)
    return q, gru_out, next_hidden_state


# ----------------------------------------------------------------------------
# Pure-JAX reference (same math) for a correctness check.
# ----------------------------------------------------------------------------
def _reference(params, state, h0, reset):
    (w_ih, w_hh, b_ih, b_hh, w0, b0, w1, b1, w2, b2) = params
    H = h0.shape[-1]

    def cell(h, inp):
        x_t, r_t = inp
        h = h * (1.0 - r_t[:, None])
        gi = x_t @ w_ih.T + b_ih
        gh = h @ w_hh.T + b_hh
        r = jax.nn.sigmoid(gi[:, :H] + gh[:, :H])
        z = jax.nn.sigmoid(gi[:, H:2 * H] + gh[:, H:2 * H])
        n = jnp.tanh(gi[:, 2 * H:] + r * gh[:, 2 * H:])
        h_new = (1.0 - z) * n + z * h
        return h_new, h_new

    h_last, outs = lax.scan(cell, h0, (jnp.transpose(state, (1, 0, 2)), reset.T))
    gru_out = jnp.transpose(outs, (1, 0, 2))
    a = jax.nn.relu(gru_out)
    a = jax.nn.relu(a @ w0.T + b0)
    a = jax.nn.relu(a @ w1.T + b1)
    q = a @ w2.T + b2
    return q, gru_out, h_last[None]


if __name__ == "__main__":
    N, L, H_in, H, A = 2, 8, 4, 32, 5      # batch, seq, obs dim, hidden, actions

    key = jax.random.PRNGKey(0)
    k = jax.random.split(key, 8)
    params = (
        _orthogonal(k[0], (3 * H, H_in)),            # GRU weight_ih_l0
        _orthogonal(k[1], (3 * H, H)),               # GRU weight_hh_l0
        jnp.zeros((3 * H,), jnp.float32),            # GRU bias_ih_l0
        jnp.zeros((3 * H,), jnp.float32),            # GRU bias_hh_l0
        _orthogonal(k[2], (H, H)), jnp.zeros((H,), jnp.float32),   # fc0
        _orthogonal(k[3], (H, H)), jnp.zeros((H,), jnp.float32),   # fc1
        _orthogonal(k[4], (A, H)), jnp.zeros((A,), jnp.float32),   # fc2
    )

    state = jax.random.normal(k[5], (N, L, H_in), jnp.float32)
    hidden_state = jax.random.normal(k[6], (1, N, H), jnp.float32)
    dones = (jax.random.uniform(k[7], (N, L)) < 0.25).astype(jnp.float32)

    # seq_block=4 -> grid of 2 chunks, exercising the carried hidden state.
    q, gru_out, next_h = rnn_qnetwork_forward(params, state, hidden_state,
                                              dones=dones, seq_block=4)
    jax.block_until_ready((q, gru_out, next_h))

    q_r, gru_r, h_r = _reference(params, state, hidden_state[0], dones)
    assert q.shape == (N, L, A) and gru_out.shape == (N, L, H) and next_h.shape == (1, N, H)
    assert jnp.allclose(q, q_r, atol=1e-4, rtol=1e-4)
    assert jnp.allclose(gru_out, gru_r, atol=1e-4, rtol=1e-4)
    assert jnp.allclose(next_h, h_r, atol=1e-4, rtol=1e-4)

    print("KERNEL_OK")
</pallas_src>

<mosaic_0001>
module attributes {stable_mosaic.version = 11 : i64} {
  func.func @rnn_qnet_kernel(%arg0: i32, %arg1: memref<8x4xf32, #tpu.memory_space<vmem>>, %arg2: memref<8x1xf32, #tpu.memory_space<vmem>>, %arg3: memref<2x32xf32, #tpu.memory_space<vmem>>, %arg4: memref<4x96xf32, #tpu.memory_space<vmem>>, %arg5: memref<32x96xf32, #tpu.memory_space<vmem>>, %arg6: memref<1x96xf32, #tpu.memory_space<vmem>>, %arg7: memref<1x96xf32, #tpu.memory_space<vmem>>, %arg8: memref<32x32xf32, #tpu.memory_space<vmem>>, %arg9: memref<1x32xf32, #tpu.memory_space<vmem>>, %arg10: memref<32x32xf32, #tpu.memory_space<vmem>>, %arg11: memref<1x32xf32, #tpu.memory_space<vmem>>, %arg12: memref<32x128xf32, #tpu.memory_space<vmem>>, %arg13: memref<1x128xf32, #tpu.memory_space<vmem>>, %arg14: memref<8x32xf32, #tpu.memory_space<vmem>>, %arg15: memref<8x128xf32, #tpu.memory_space<vmem>>, %arg16: memref<2x32xf32, #tpu.memory_space<vmem>>, %arg17: memref<2x32xf32, #tpu.memory_space<vmem>>) attributes {dimension_semantics = [#tpu.dimension_semantics<arbitrary>], iteration_bounds = array<i64: 2>, scalar_prefetch = 0 : i64, scratch_operands = 1 : i64, tpu.core_type = #tpu.core_type<tc>, window_params = [{transform_indices = @transform_0, window_bounds = array<i64: 8, 4>}, {transform_indices = @transform_1, window_bounds = array<i64: 8, 1>}, {pipeline_mode = #tpu.pipeline_mode<synchronous>, transform_indices = @transform_2, window_bounds = array<i64: 2, 32>}, {pipeline_mode = #tpu.pipeline_mode<synchronous>, transform_indices = @transform_3, window_bounds = array<i64: 4, 96>}, {pipeline_mode = #tpu.pipeline_mode<synchronous>, transform_indices = @transform_4, window_bounds = array<i64: 32, 96>}, {pipeline_mode = #tpu.pipeline_mode<synchronous>, transform_indices = @transform_5, window_bounds = array<i64: 1, 96>}, {pipeline_mode = #tpu.pipeline_mode<synchronous>, transform_indices = @transform_6, window_bounds = array<i64: 1, 96>}, {pipeline_mode = #tpu.pipeline_mode<synchronous>, transform_indices = @transform_7, window_bounds = array<i64: 32, 32>}, {pipeline_mode = #tpu.pipeline_mode<synchronous>, transform_indices = @transform_8, window_bounds = array<i64: 1, 32>}, {pipeline_mode = #tpu.pipeline_mode<synchronous>, transform_indices = @transform_9, window_bounds = array<i64: 32, 32>}, {pipeline_mode = #tpu.pipeline_mode<synchronous>, transform_indices = @transform_10, window_bounds = array<i64: 1, 32>}, {pipeline_mode = #tpu.pipeline_mode<synchronous>, transform_indices = @transform_11, window_bounds = array<i64: 32, 128>}, {pipeline_mode = #tpu.pipeline_mode<synchronous>, transform_indices = @transform_12, window_bounds = array<i64: 1, 128>}, {transform_indices = @transform_13, window_bounds = array<i64: 8, 32>}, {transform_indices = @transform_14, window_bounds = array<i64: 8, 128>}, {pipeline_mode = #tpu.pipeline_mode<synchronous>, transform_indices = @transform_15, window_bounds = array<i64: 2, 32>}]} {
    %c0_i32 = arith.constant 0 : i32
    %0 = arith.cmpi eq, %arg0, %c0_i32 : i32
    %1 = arith.extui %0 : i1 to i32
    %c0_i32_0 = arith.constant 0 : i32
    %2 = arith.cmpi ne, %1, %c0_i32_0 : i32
    scf.if %2 {
      %c0_61 = arith.constant 0 : index
      %c0_62 = arith.constant 0 : index
      %173 = vector.load %arg3[%c0_61, %c0_62] : memref<2x32xf32, #tpu.memory_space<vmem>>, vector<2x32xf32>
      %c0_63 = arith.constant 0 : index
      %c0_64 = arith.constant 0 : index
      %174 = vector.load %arg17[%c0_63, %c0_64] : memref<2x32xf32, #tpu.memory_space<vmem>>, vector<2x32xf32>
      tpu.vector_store %arg17[%c0_63, %c0_64], %173 {strides = array<i32>} : memref<2x32xf32, #tpu.memory_space<vmem>>, vector<2x32xf32>,
    } else {
    }
    %c0 = arith.constant 0 : index
    %c0_1 = arith.constant 0 : index
    %3 = vector.load %arg1[%c0, %c0_1] : memref<8x4xf32, #tpu.memory_space<vmem>>, vector<8x4xf32>
    %c0_2 = arith.constant 0 : index
    %c0_3 = arith.constant 0 : index
    %4 = vector.load %arg4[%c0_2, %c0_3] : memref<4x96xf32, #tpu.memory_space<vmem>>, vector<4x96xf32>
    %cst = arith.constant dense<0.000000e+00> : vector<8x96xf32>
    %5 = tpu.matmul %3, %4, %cst {dimension_numbers = #tpu.dot_dimension_numbers<[1], [0], [0], [1], [0, 0, 1, 1], [], []>} : vector<8x4xf32>, vector<4x96xf32>, vector<8x96xf32> -> vector<8x96xf32>
    %c0_4 = arith.constant 0 : index
    %c0_5 = arith.constant 0 : index
    %6 = vector.load %arg6[%c0_4, %c0_5] : memref<1x96xf32, #tpu.memory_space<vmem>>, vector<1x96xf32>
    %7 = vector.broadcast %6 : vector<1x96xf32> to vector<8x96xf32>
    %8 = arith.addf %5, %7 : vector<8x96xf32>
    %9 = vector.extract_strided_slice %8 {offsets = [0, 0], sizes = [8, 32], strides = [1, 1]} : vector<8x96xf32> to vector<8x32xf32>
    %10 = vector.extract_strided_slice %8 {offsets = [0, 32], sizes = [8, 32], strides = [1, 1]} : vector<8x96xf32> to vector<8x32xf32>
    %11 = vector.extract_strided_slice %8 {offsets = [0, 64], sizes = [8, 32], strides = [1, 1]} : vector<8x96xf32> to vector<8x32xf32>
    %c0_6 = arith.constant 0 : index
    %c0_7 = arith.constant 0 : index
    %12 = vector.load %arg5[%c0_6, %c0_7] : memref<32x96xf32, #tpu.memory_space<vmem>>, vector<32x96xf32>
    %c0_8 = arith.constant 0 : index
    %c0_9 = arith.constant 0 : index
    %13 = vector.load %arg7[%c0_8, %c0_9] : memref<1x96xf32, #tpu.memory_space<vmem>>, vector<1x96xf32>
    %c0_10 = arith.constant 0 : index
    %c0_11 = arith.constant 0 : index
    %14 = vector.load %arg2[%c0_10, %c0_11] : memref<8x1xf32, #tpu.memory_space<vmem>>, vector<8x1xf32>
    %c0_12 = arith.constant 0 : index
    %c0_13 = arith.constant 0 : index
    %15 = vector.load %arg17[%c0_12, %c0_13] : memref<2x32xf32, #tpu.memory_space<vmem>>, vector<2x32xf32>
    %16 = vector.extract_strided_slice %14 {offsets = [0, 0], sizes = [2, 1], strides = [1, 1]} : vector<8x1xf32> to vector<2x1xf32>
    %17 = vector.broadcast %16 : vector<2x1xf32> to vector<2x32xf32>
    %18 = arith.mulf %15, %17 : vector<2x32xf32>
    %cst_14 = arith.constant dense<0.000000e+00> : vector<2x96xf32>
    %19 = tpu.matmul %18, %12, %cst_14 {dimension_numbers = #tpu.dot_dimension_numbers<[1], [0], [0], [1], [0, 0, 1, 1], [], []>} : vector<2x32xf32>, vector<32x96xf32>, vector<2x96xf32> -> vector<2x96xf32>
    %20 = vector.broadcast %13 : vector<1x96xf32> to vector<2x96xf32>
    %21 = arith.addf %19, %20 : vector<2x96xf32>
    %22 = vector.extract_strided_slice %9 {offsets = [0, 0], sizes = [2, 32], strides = [1, 1]} : vector<8x32xf32> to vector<2x32xf32>
    %23 = vector.extract_strided_slice %21 {offsets = [0, 0], sizes = [2, 32], strides = [1, 1]} : vector<2x96xf32> to vector<2x32xf32>
    %24 = arith.addf %22, %23 : vector<2x32xf32>
    %25 = arith.negf %24 : vector<2x32xf32>
    %26 = math.exp %25 : vector<2x32xf32>
    %cst_15 = arith.constant 1.000000e+00 : f32
    %27 = vector.broadcast %cst_15 : f32 to vector<2x32xf32>
    %28 = arith.addf %27, %26 : vector<2x32xf32>
    %29 = arith.divf %27, %28 : vector<2x32xf32>
    %30 = vector.extract_strided_slice %10 {offsets = [0, 0], sizes = [2, 32], strides = [1, 1]} : vector<8x32xf32> to vector<2x32xf32>
    %31 = vector.extract_strided_slice %21 {offsets = [0, 32], sizes = [2, 32], strides = [1, 1]} : vector<2x96xf32> to vector<2x32xf32>
    %32 = arith.addf %30, %31 : vector<2x32xf32>
    %33 = arith.negf %32 : vector<2x32xf32>
    %34 = math.exp %33 : vector<2x32xf32>
    %cst_16 = arith.constant 1.000000e+00 : f32
    %35 = vector.broadcast %cst_16 : f32 to vector<2x32xf32>
    %36 = arith.addf %35, %34 : vector<2x32xf32>
    %37 = arith.divf %35, %36 : vector<2x32xf32>
    %38 = vector.extract_strided_slice %11 {offsets = [0, 0], sizes = [2, 32], strides = [1, 1]} : vector<8x32xf32> to vector<2x32xf32>
    %39 = vector.extract_strided_slice %21 {offsets = [0, 64], sizes = [2, 32], strides = [1, 1]} : vector<2x96xf32> to vector<2x32xf32>
    %40 = arith.mulf %29, %39 : vector<2x32xf32>
    %41 = arith.addf %38, %40 : vector<2x32xf32>
    %42 = math.tanh %41 : vector<2x32xf32>
    %cst_17 = arith.constant 1.000000e+00 : f32
    %43 = vector.broadcast %cst_17 : f32 to vector<2x32xf32>
    %44 = arith.subf %43, %37 : vector<2x32xf32>
    %45 = arith.mulf %44, %42 : vector<2x32xf32>
    %46 = arith.mulf %37, %18 : vector<2x32xf32>
    %47 = arith.addf %45, %46 : vector<2x32xf32>
    %c0_18 = arith.constant 0 : index
    %c0_19 = arith.constant 0 : index
    %48 = vector.load %arg14[%c0_18, %c0_19] : memref<8x32xf32, #tpu.memory_space<vmem>>, vector<2x32xf32>
    tpu.vector_store %arg14[%c0_18, %c0_19], %47 {strides = array<i32>} : memref<8x32xf32, #tpu.memory_space<vmem>>, vector<2x32xf32>,
    %49 = vector.extract_strided_slice %14 {offsets = [2, 0], sizes = [2, 1], strides = [1, 1]} : vector<8x1xf32> to vector<2x1xf32>
    %50 = vector.broadcast %49 : vector<2x1xf32> to vector<2x32xf32>
    %51 = arith.mulf %47, %50 : vector<2x32xf32>
    %cst_20 = arith.constant dense<0.000000e+00> : vector<2x96xf32>
    %52 = tpu.matmul %51, %12, %cst_20 {dimension_numbers = #tpu.dot_dimension_numbers<[1], [0], [0], [1], [0, 0, 1, 1], [], []>} : vector<2x32xf32>, vector<32x96xf32>, vector<2x96xf32> -> vector<2x96xf32>
    %53 = vector.broadcast %13 : vector<1x96xf32> to vector<2x96xf32>
    %54 = arith.addf %52, %53 : vector<2x96xf32>
    %55 = vector.extract_strided_slice %9 {offsets = [2, 0], sizes = [2, 32], strides = [1, 1]} : vector<8x32xf32> to vector<2x32xf32>
    %56 = vector.extract_strided_slice %54 {offsets = [0, 0], sizes = [2, 32], strides = [1, 1]} : vector<2x96xf32> to vector<2x32xf32>
    %57 = arith.addf %55, %56 : vector<2x32xf32>
    %58 = arith.negf %57 : vector<2x32xf32>
    %59 = math.exp %58 : vector<2x32xf32>
    %cst_21 = arith.constant 1.000000e+00 : f32
    %60 = vector.broadcast %cst_21 : f32 to vector<2x32xf32>
    %61 = arith.addf %60, %59 : vector<2x32xf32>
    %62 = arith.divf %60, %61 : vector<2x32xf32>
    %63 = vector.extract_strided_slice %10 {offsets = [2, 0], sizes = [2, 32], strides = [1, 1]} : vector<8x32xf32> to vector<2x32xf32>
    %64 = vector.extract_strided_slice %54 {offsets = [0, 32], sizes = [2, 32], strides = [1, 1]} : vector<2x96xf32> to vector<2x32xf32>
    %65 = arith.addf %63, %64 : vector<2x32xf32>
    %66 = arith.negf %65 : vector<2x32xf32>
    %67 = math.exp %66 : vector<2x32xf32>
    %cst_22 = arith.constant 1.000000e+00 : f32
    %68 = vector.broadcast %cst_22 : f32 to vector<2x32xf32>
    %69 = arith.addf %68, %67 : vector<2x32xf32>
    %70 = arith.divf %68, %69 : vector<2x32xf32>
    %71 = vector.extract_strided_slice %11 {offsets = [2, 0], sizes = [2, 32], strides = [1, 1]} : vector<8x32xf32> to vector<2x32xf32>
    %72 = vector.extract_strided_slice %54 {offsets = [0, 64], sizes = [2, 32], strides = [1, 1]} : vector<2x96xf32> to vector<2x32xf32>
    %73 = arith.mulf %62, %72 : vector<2x32xf32>
    %74 = arith.addf %71, %73 : vector<2x32xf32>
    %75 = math.tanh %74 : vector<2x32xf32>
    %cst_23 = arith.constant 1.000000e+00 : f32
    %76 = vector.broadcast %cst_23 : f32 to vector<2x32xf32>
    %77 = arith.subf %76, %70 : vector<2x32xf32>
    %78 = arith.mulf %77, %75 : vector<2x32xf32>
    %79 = arith.mulf %70, %51 : vector<2x32xf32>
    %80 = arith.addf %78, %79 : vector<2x32xf32>
    %c2 = arith.constant 2 : index
    %c0_24 = arith.constant 0 : index
    %81 = vector.load %arg14[%c2, %c0_24] : memref<8x32xf32, #tpu.memory_space<vmem>>, vector<2x32xf32>
    tpu.vector_store %arg14[%c2, %c0_24], %80 {strides = array<i32>} : memref<8x32xf32, #tpu.memory_space<vmem>>, vector<2x32xf32>,
    %82 = vector.extract_strided_slice %14 {offsets = [4, 0], sizes = [2, 1], strides = [1, 1]} : vector<8x1xf32> to vector<2x1xf32>
    %83 = vector.broadcast %82 : vector<2x1xf32> to vector<2x32xf32>
    %84 = arith.mulf %80, %83 : vector<2x32xf32>
    %cst_25 = arith.constant dense<0.000000e+00> : vector<2x96xf32>
    %85 = tpu.matmul %84, %12, %cst_25 {dimension_numbers = #tpu.dot_dimension_numbers<[1], [0], [0], [1], [0, 0, 1, 1], [], []>} : vector<2x32xf32>, vector<32x96xf32>, vector<2x96xf32> -> vector<2x96xf32>
    %86 = vector.broadcast %13 : vector<1x96xf32> to vector<2x96xf32>
    %87 = arith.addf %85, %86 : vector<2x96xf32>
    %88 = vector.extract_strided_slice %9 {offsets = [4, 0], sizes = [2, 32], strides = [1, 1]} : vector<8x32xf32> to vector<2x32xf32>
    %89 = vector.extract_strided_slice %87 {offsets = [0, 0], sizes = [2, 32], strides = [1, 1]} : vector<2x96xf32> to vector<2x32xf32>
    %90 = arith.addf %88, %89 : vector<2x32xf32>
    %91 = arith.negf %90 : vector<2x32xf32>
    %92 = math.exp %91 : vector<2x32xf32>
    %cst_26 = arith.constant 1.000000e+00 : f32
    %93 = vector.broadcast %cst_26 : f32 to vector<2x32xf32>
    %94 = arith.addf %93, %92 : vector<2x32xf32>
    %95 = arith.divf %93, %94 : vector<2x32xf32>
    %96 = vector.extract_strided_slice %10 {offsets = [4, 0], sizes = [2, 32], strides = [1, 1]} : vector<8x32xf32> to vector<2x32xf32>
    %97 = vector.extract_strided_slice %87 {offsets = [0, 32], sizes = [2, 32], strides = [1, 1]} : vector<2x96xf32> to vector<2x32xf32>
    %98 = arith.addf %96, %97 : vector<2x32xf32>
    %99 = arith.negf %98 : vector<2x32xf32>
    %100 = math.exp %99 : vector<2x32xf32>
    %cst_27 = arith.constant 1.000000e+00 : f32
    %101 = vector.broadcast %cst_27 : f32 to vector<2x32xf32>
    %102 = arith.addf %101, %100 : vector<2x32xf32>
    %103 = arith.divf %101, %102 : vector<2x32xf32>
    %104 = vector.extract_strided_slice %11 {offsets = [4, 0], sizes = [2, 32], strides = [1, 1]} : vector<8x32xf32> to vector<2x32xf32>
    %105 = vector.extract_strided_slice %87 {offsets = [0, 64], sizes = [2, 32], strides = [1, 1]} : vector<2x96xf32> to vector<2x32xf32>
    %106 = arith.mulf %95, %105 : vector<2x32xf32>
    %107 = arith.addf %104, %106 : vector<2x32xf32>
    %108 = math.tanh %107 : vector<2x32xf32>
    %cst_28 = arith.constant 1.000000e+00 : f32
    %109 = vector.broadcast %cst_28 : f32 to vector<2x32xf32>
    %110 = arith.subf %109, %103 : vector<2x32xf32>
    %111 = arith.mulf %110, %108 : vector<2x32xf32>
    %112 = arith.mulf %103, %84 : vector<2x32xf32>
    %113 = arith.addf %111, %112 : vector<2x32xf32>
    %c4 = arith.constant 4 : index
    %c0_29 = arith.constant 0 : index
    %114 = vector.load %arg14[%c4, %c0_29] : memref<8x32xf32, #tpu.memory_space<vmem>>, vector<2x32xf32>
    tpu.vector_store %arg14[%c4, %c0_29], %113 {strides = array<i32>} : memref<8x32xf32, #tpu.memory_space<vmem>>, vector<2x32xf32>,
    %115 = vector.extract_strided_slice %14 {offsets = [6, 0], sizes = [2, 1], strides = [1, 1]} : vector<8x1xf32> to vector<2x1xf32>
    %116 = vector.broadcast %115 : vector<2x1xf32> to vector<2x32xf32>
    %117 = arith.mulf %113, %116 : vector<2x32xf32>
    %cst_30 = arith.constant dense<0.000000e+00> : vector<2x96xf32>
    %118 = tpu.matmul %117, %12, %cst_30 {dimension_numbers = #tpu.dot_dimension_numbers<[1], [0], [0], [1], [0, 0, 1, 1], [], []>} : vector<2x32xf32>, vector<32x96xf32>, vector<2x96xf32> -> vector<2x96xf32>
    %119 = vector.broadcast %13 : vector<1x96xf32> to vector<2x96xf32>
    %120 = arith.addf %118, %119 : vector<2x96xf32>
    %121 = vector.extract_strided_slice %9 {offsets = [6, 0], sizes = [2, 32], strides = [1, 1]} : vector<8x32xf32> to vector<2x32xf32>
    %122 = vector.extract_strided_slice %120 {offsets = [0, 0], sizes = [2, 32], strides = [1, 1]} : vector<2x96xf32> to vector<2x32xf32>
    %123 = arith.addf %121, %122 : vector<2x32xf32>
    %124 = arith.negf %123 : vector<2x32xf32>
    %125 = math.exp %124 : vector<2x32xf32>
    %cst_31 = arith.constant 1.000000e+00 : f32
    %126 = vector.broadcast %cst_31 : f32 to vector<2x32xf32>
    %127 = arith.addf %126, %125 : vector<2x32xf32>
    %128 = arith.divf %126, %127 : vector<2x32xf32>
    %129 = vector.extract_strided_slice %10 {offsets = [6, 0], sizes = [2, 32], strides = [1, 1]} : vector<8x32xf32> to vector<2x32xf32>
    %130 = vector.extract_strided_slice %120 {offsets = [0, 32], sizes = [2, 32], strides = [1, 1]} : vector<2x96xf32> to vector<2x32xf32>
    %131 = arith.addf %129, %130 : vector<2x32xf32>
    %132 = arith.negf %131 : vector<2x32xf32>
    %133 = math.exp %132 : vector<2x32xf32>
    %cst_32 = arith.constant 1.000000e+00 : f32
    %134 = vector.broadcast %cst_32 : f32 to vector<2x32xf32>
    %135 = arith.addf %134, %133 : vector<2x32xf32>
    %136 = arith.divf %134, %135 : vector<2x32xf32>
    %137 = vector.extract_strided_slice %11 {offsets = [6, 0], sizes = [2, 32], strides = [1, 1]} : vector<8x32xf32> to vector<2x32xf32>
    %138 = vector.extract_strided_slice %120 {offsets = [0, 64], sizes = [2, 32], strides = [1, 1]} : vector<2x96xf32> to vector<2x32xf32>
    %139 = arith.mulf %128, %138 : vector<2x32xf32>
    %140 = arith.addf %137, %139 : vector<2x32xf32>
    %141 = math.tanh %140 : vector<2x32xf32>
    %cst_33 = arith.constant 1.000000e+00 : f32
    %142 = vector.broadcast %cst_33 : f32 to vector<2x32xf32>
    %143 = arith.subf %142, %136 : vector<2x32xf32>
    %144 = arith.mulf %143, %141 : vector<2x32xf32>
    %145 = arith.mulf %136, %117 : vector<2x32xf32>
    %146 = arith.addf %144, %145 : vector<2x32xf32>
    %c6 = arith.constant 6 : index
    %c0_34 = arith.constant 0 : index
    %147 = vector.load %arg14[%c6, %c0_34] : memref<8x32xf32, #tpu.memory_space<vmem>>, vector<2x32xf32>
    tpu.vector_store %arg14[%c6, %c0_34], %146 {strides = array<i32>} : memref<8x32xf32, #tpu.memory_space<vmem>>, vector<2x32xf32>,
    %c0_35 = arith.constant 0 : index
    %c0_36 = arith.constant 0 : index
    %148 = vector.load %arg17[%c0_35, %c0_36] : memref<2x32xf32, #tpu.memory_space<vmem>>, vector<2x32xf32>
    tpu.vector_store %arg17[%c0_35, %c0_36], %146 {strides = array<i32>} : memref<2x32xf32, #tpu.memory_space<vmem>>, vector<2x32xf32>,
    %c0_37 = arith.constant 0 : index
    %c0_38 = arith.constant 0 : index
    %149 = vector.load %arg16[%c0_37, %c0_38] : memref<2x32xf32, #tpu.memory_space<vmem>>, vector<2x32xf32>
    tpu.vector_store %arg16[%c0_37, %c0_38], %146 {strides = array<i32>} : memref<2x32xf32, #tpu.memory_space<vmem>>, vector<2x32xf32>,
    %c0_39 = arith.constant 0 : index
    %c0_40 = arith.constant 0 : index
    %150 = vector.load %arg14[%c0_39, %c0_40] : memref<8x32xf32, #tpu.memory_space<vmem>>, vector<8x32xf32>
    %cst_41 = arith.constant 0.000000e+00 : f32
    %151 = vector.broadcast %cst_41 : f32 to vector<8x32xf32>
    %152 = arith.maximumf %150, %151 : vector<8x32xf32>
    %c0_42 = arith.constant 0 : index
    %c0_43 = arith.constant 0 : index
    %153 = vector.load %arg8[%c0_42, %c0_43] : memref<32x32xf32, #tpu.memory_space<vmem>>, vector<32x32xf32>
    %cst_44 = arith.constant dense<0.000000e+00> : vector<8x32xf32>
    %154 = tpu.matmul %152, %153, %cst_44 {dimension_numbers = #tpu.dot_dimension_numbers<[1], [0], [0], [1], [0, 0, 1, 1], [], []>} : vector<8x32xf32>, vector<32x32xf32>, vector<8x32xf32> -> vector<8x32xf32>
    %c0_45 = arith.constant 0 : index
    %c0_46 = arith.constant 0 : index
    %155 = vector.load %arg9[%c0_45, %c0_46] : memref<1x32xf32, #tpu.memory_space<vmem>>, vector<1x32xf32>
    %156 = vector.broadcast %155 : vector<1x32xf32> to vector<8x32xf32>
    %157 = arith.addf %154, %156 : vector<8x32xf32>
    %cst_47 = arith.constant 0.000000e+00 : f32
    %158 = vector.broadcast %cst_47 : f32 to vector<8x32xf32>
    %159 = arith.maximumf %157, %158 : vector<8x32xf32>
    %c0_48 = arith.constant 0 : index
    %c0_49 = arith.constant 0 : index
    %160 = vector.load %arg10[%c0_48, %c0_49] : memref<32x32xf32, #tpu.memory_space<vmem>>, vector<32x32xf32>
    %cst_50 = arith.constant dense<0.000000e+00> : vector<8x32xf32>
    %161 = tpu.matmul %159, %160, %cst_50 {dimension_numbers = #tpu.dot_dimension_numbers<[1], [0], [0], [1], [0, 0, 1, 1], [], []>} : vector<8x32xf32>, vector<32x32xf32>, vector<8x32xf32> -> vector<8x32xf32>
    %c0_51 = arith.constant 0 : index
    %c0_52 = arith.constant 0 : index
    %162 = vector.load %arg11[%c0_51, %c0_52] : memref<1x32xf32, #tpu.memory_space<vmem>>, vector<1x32xf32>
    %163 = vector.broadcast %162 : vector<1x32xf32> to vector<8x32xf32>
    %164 = arith.addf %161, %163 : vector<8x32xf32>
    %cst_53 = arith.constant 0.000000e+00 : f32
    %165 = vector.broadcast %cst_53 : f32 to vector<8x32xf32>
    %166 = arith.maximumf %164, %165 : vector<8x32xf32>
    %c0_54 = arith.constant 0 : index
    %c0_55 = arith.constant 0 : index
    %167 = vector.load %arg12[%c0_54, %c0_55] : memref<32x128xf32, #tpu.memory_space<vmem>>, vector<32x128xf32>
    %cst_56 = arith.constant dense<0.000000e+00> : vector<8x128xf32>
    %168 = tpu.matmul %166, %167, %cst_56 {dimension_numbers = #tpu.dot_dimension_numbers<[1], [0], [0], [1], [0, 0, 1, 1], [], []>} : vector<8x32xf32>, vector<32x128xf32>, vector<8x128xf32> -> vector<8x128xf32>
    %c0_57 = arith.constant 0 : index
    %c0_58 = arith.constant 0 : index
    %169 = vector.load %arg13[%c0_57, %c0_58] : memref<1x128xf32, #tpu.memory_space<vmem>>, vector<1x128xf32>
    %170 = vector.broadcast %169 : vector<1x128xf32> to vector<8x128xf32>
    %171 = arith.addf %168, %170 : vector<8x128xf32>
    %c0_59 = arith.constant 0 : index
    %c0_60 = arith.constant 0 : index
    %172 = vector.load %arg15[%c0_59, %c0_60] : memref<8x128xf32, #tpu.memory_space<vmem>>, vector<8x128xf32>
    tpu.vector_store %arg15[%c0_59, %c0_60], %171 {strides = array<i32>} : memref<8x128xf32, #tpu.memory_space<vmem>>, vector<8x128xf32>,
    return
  }
  func.func @transform_0(%arg0: i32) -> (i32, i32) {
    %c0_i32 = arith.constant 0 : i32
    %c0_i32_0 = arith.constant 0 : i32
    return %arg0, %c0_i32 : i32, i32
  }
  func.func @transform_1(%arg0: i32) -> (i32, i32) {
    %c0_i32 = arith.constant 0 : i32
    %c0_i32_0 = arith.constant 0 : i32
    return %arg0, %c0_i32 : i32, i32
  }
  func.func @transform_2(%arg0: i32) -> (i32, i32) {
    %c0_i32 = arith.constant 0 : i32
    %c0_i32_0 = arith.constant 0 : i32
    %c0_i32_1 = arith.constant 0 : i32
    return %c0_i32, %c0_i32_0 : i32, i32
  }
  func.func @transform_3(%arg0: i32) -> (i32, i32) {
    %c0_i32 = arith.constant 0 : i32
    %c0_i32_0 = arith.constant 0 : i32
    %c0_i32_1 = arith.constant 0 : i32
    return %c0_i32, %c0_i32_0 : i32, i32
  }
  func.func @transform_4(%arg0: i32) -> (i32, i32) {
    %c0_i32 = arith.constant 0 : i32
    %c0_i32_0 = arith.constant 0 : i32
    %c0_i32_1 = arith.constant 0 : i32
    return %c0_i32, %c0_i32_0 : i32, i32
  }
  func.func @transform_5(%arg0: i32) -> (i32, i32) {
    %c0_i32 = arith.constant 0 : i32
    %c0_i32_0 = arith.constant 0 : i32
    %c0_i32_1 = arith.constant 0 : i32
    return %c0_i32, %c0_i32_0 : i32, i32
  }
  func.func @transform_6(%arg0: i32) -> (i32, i32) {
    %c0_i32 = arith.constant 0 : i32
    %c0_i32_0 = arith.constant 0 : i32
    %c0_i32_1 = arith.constant 0 : i32
    return %c0_i32, %c0_i32_0 : i32, i32
  }
  func.func @transform_7(%arg0: i32) -> (i32, i32) {
    %c0_i32 = arith.constant 0 : i32
    %c0_i32_0 = arith.constant 0 : i32
    %c0_i32_1 = arith.constant 0 : i32
    return %c0_i32, %c0_i32_0 : i32, i32
  }
  func.func @transform_8(%arg0: i32) -> (i32, i32) {
    %c0_i32 = arith.constant 0 : i32
    %c0_i32_0 = arith.constant 0 : i32
    %c0_i32_1 = arith.constant 0 : i32
    return %c0_i32, %c0_i32_0 : i32, i32
  }
  func.func @transform_9(%arg0: i32) -> (i32, i32) {
    %c0_i32 = arith.constant 0 : i32
    %c0_i32_0 = arith.constant 0 : i32
    %c0_i32_1 = arith.constant 0 : i32
    return %c0_i32, %c0_i32_0 : i32, i32
  }
  func.func @transform_10(%arg0: i32) -> (i32, i32) {
    %c0_i32 = arith.constant 0 : i32
    %c0_i32_0 = arith.constant 0 : i32
    %c0_i32_1 = arith.constant 0 : i32
    return %c0_i32, %c0_i32_0 : i32, i32
  }
  func.func @transform_11(%arg0: i32) -> (i32, i32) {
    %c0_i32 = arith.constant 0 : i32
    %c0_i32_0 = arith.constant 0 : i32
    %c0_i32_1 = arith.constant 0 : i32
    return %c0_i32, %c0_i32_0 : i32, i32
  }
  func.func @transform_12(%arg0: i32) -> (i32, i32) {
    %c0_i32 = arith.constant 0 : i32
    %c0_i32_0 = arith.constant 0 : i32
    %c0_i32_1 = arith.constant 0 : i32
    return %c0_i32, %c0_i32_0 : i32, i32
  }
  func.func @transform_13(%arg0: i32) -> (i32, i32) {
    %c0_i32 = arith.constant 0 : i32
    %c0_i32_0 = arith.constant 0 : i32
    return %arg0, %c0_i32 : i32, i32
  }
  func.func @transform_14(%arg0: i32) -> (i32, i32) {
    %c0_i32 = arith.constant 0 : i32
    %c0_i32_0 = arith.constant 0 : i32
    return %arg0, %c0_i32 : i32, i32
  }
  func.func @transform_15(%arg0: i32) -> (i32, i32) {
    %c0_i32 = arith.constant 0 : i32
    %c0_i32_0 = arith.constant 0 : i32
    %c0_i32_1 = arith.constant 0 : i32
    return %c0_i32, %c0_i32_0 : i32, i32
  }
}

</mosaic_0001>

<bundles_post_ra>
// kernel: tpu_custom_call.1
= control target key start
LH: loop header
LB: loop body
LE: loop exit
PB: predicated region body
PF: predicated region fallthrough
CT: control target
= control target key end

     0   :  { %s2786_s0 = inlined_call_operand.vmem [shape: f32[16,4], index: 0, kind: input, shape index: {}]   ;;  %s2787_s1 = inlined_call_operand.vmem [shape: f32[16,1], index: 1, kind: input, shape index: {}]   ;;  %s2788_s2 = inlined_call_operand.vmem [shape: f32[2,32], index: 2, kind: input, shape index: {}]   ;;  %s2789_s3 = inlined_call_operand.hbm [shape: f32[4,96], index: 3, kind: input, shape index: {}]   ;;  %s2790_s4 = inlined_call_operand.vmem [shape: f32[32,96], index: 4, kind: input, shape index: {}]   ;;  %s2791_s5 = inlined_call_operand.vmem [shape: f32[1,96], index: 5, kind: input, shape index: {}]   ;;  %s2792_s6 = inlined_call_operand.hbm [shape: f32[1,96], index: 6, kind: input, shape index: {}]   ;;  %s2793_s7 = inlined_call_operand.hbm [shape: f32[32,32], index: 7, kind: input, shape index: {}]   ;;  %s2794_s8 = inlined_call_operand.hbm [shape: f32[1,32], index: 8, kind: input, shape index: {}]   ;;  %s2795_s9 = inlined_call_operand.vmem [shape: f32[32,32], index: 9, kind: input, shape index: {}]   ;;  %s2796_s10 = inlined_call_operand.vmem [shape: f32[1,32], index: 10, kind: input, shape index: {}]   ;;  %s2797_s11 = inlined_call_operand.hbm [shape: f32[32,128], index: 11, kind: input, shape index: {}]   ;;  %s2798_s12 = inlined_call_operand.vmem [shape: f32[1,128], index: 12, kind: input, shape index: {}]   ;;  %s2799_s13 = inlined_call_operand.hbm [shape: f32[16,32], index: 13, kind: output, shape index: {0}]   ;;  %s2800_s14 = inlined_call_operand.hbm [shape: f32[16,128], index: 14, kind: output, shape index: {1}]   ;;  %s2801_s15 = inlined_call_operand.hbm [shape: f32[2,32], index: 15, kind: output, shape index: {2}]  }
   0x1   :  { %2816 = sst [smem:[#allocation28_spill]] %s2789_s3 }
   0x2   :  { %2817 = sst [smem:[#allocation29_spill]] %s2792_s6 }
   0x3   :  { %2818 = sst [smem:[#allocation30_spill]] %s2798_s12 }
   0x4   :  { %2819 = sst [smem:[#allocation31_spill]] %s2800_s14 }
   0x5   :  { %2820 = sst [smem:[#allocation32_spill]] %s2801_s15 }
   0x6   :  { %21 = vsyncpa [#allocation4], 0 }
   0x7   :  { %22 = vsyncpa [#allocation7], 0 }
   0x8   :  { %23 = vsyncpa [#allocation10], 0 }
   0x9   :  { %24 = vsyncpa [#allocation5], 0 }
   0xa   :  { %26 = vsyncpa [#allocation5 + $0x1], 0 }
   0xb   :  { %27 = vsyncpa [#allocation14], 0 }
   0xc   :  { %29 = vsyncpa [#allocation14 + $0x1], 0  ;;  %s2326_s18 = smov 0   ;;  %s2328_s19 = smov 0  }
   0xd   :  { %s2330_s20 = smov 0   ;;  %s2332_s21 = smov 0  }
   0xe LB: > { %2821 = sst [smem:[#allocation22_spill]] %s2215_s18  ;;  %s2347_s22 = sadd.s32 4294967295, %s2227_s21   ;;  %s2227_s21 = sphi %s2332_s21, %s2857_s21   ;;  %s2223_s20 = sphi %s2330_s20, %s2859_s20   ;;  %s2219_s19 = sphi %s2328_s19, %s2861_s19   ;;  %s2215_s18 = sphi %s2326_s18, %s2860_s18  }
   0xf   : > { %2822 = sst [smem:[#allocation23_spill]] %s2223_s20  ;;  %s2802_s23 = sadd.s32 4294967294, %s2227_s21  }
  0x10   : > { %2823 = sst [smem:[#allocation24_spill]] %s2227_s21  ;;  %s2351_s24 = sadd.s32 1, %s2227_s21  }
  0x11   : > { %2824 = sst [smem:[#allocation25_spill]] %s2351_s24  ;;  %s325_s25 = sadd.s32 1, %s2223_s20 }
  0x12   : > { %s322_s26 = ssub.s32 %s2227_s21, %s2351_s24  ;;  %p335_p0 = scmp.ne.s32.totalorder %s2223_s20, %s2219_s19 }
  0x13   : > { %p323_p1 = scmp.eq.s32.totalorder %s322_s26, 0  ;;  %p2811_p2 = scmp.eq.s32.totalorder %s2347_s22, 1 }
  0x14   : > { %p341_p3 = scmp.ne.s32.totalorder %s2219_s19, %s2215_s18  ;;  %p342_p4 = scmp.eq.s32.totalorder %s2802_s23, 1 }
  0x15   : > { %s2364_s27 = scalar_select %p323_p1, %s2223_s20, %s325_s25  }
  0x16   : > { %p2368_p5 = por %p2811_p2, %p335_p0  ;;  %p2372_p6 = por %p342_p4, %p341_p3 }
  0x17   : > { %2825 = sst [smem:[#allocation26_spill]] %s2364_s27  ;;  %p1610_p7 = scmp.ge.s32.totalorder %s2227_s21, 1 }
  0x18   : > { %s2826_s28 = scalar_select %p2368_p5, 1, 0 }
  0x19   : > { %s2827_s29 = scalar_select %p2372_p6, 1, 0 }
  0x1a   : > { %p396_p8 = scmp.lt.s32.totalorder %s2227_s21, 3  ;;  %p2812_p10 = scmp.eq.s32.totalorder %s2347_s22, 0 }
  0x1b   : > { %2828 = sst [smem:[#allocation27_spill]] %s2827_s29  ;;  %s2229_s16 = smov [#allocation6]  }
  0x1c   : > { %p2380_p11 = pnand %p1610_p7, %p396_p8  ;;  %s429_s17 = sshll.u32 %s2229_s16, 4  ;;  %s430_s17 = int_to_ptr.vmem [resolvable:$true] %s429_s17 }
  0x1d   : > { %s2230_s25 = smov [#allocation9]   ;;  %s2231_s27 = smov [#allocation3]  }
  0x1e   : > { %s2829_s30 = scalar_select %p2380_p11, 1, 0 }
  0x1f   : > { %p1843_p12 = pneg %p2380_p11  ;;  %s453_s26 = sshll.u32 %s2230_s25, 4  ;;  %s2392_s26 = int_to_ptr.vmem [resolvable:$true] %s453_s26 }
  0x20   : > { %s412_s20 = sshll.u32 %s2231_s27, 4  ;;  %s2831_s6 = sld [smem:[#allocation29_spill]]  ;;  %s2394_s20 = int_to_ptr.vmem [resolvable:$true] %s412_s20 }
  0x21   : > { %p2388_p13 = pnand %p2812_p10, %p1843_p12 }
  0x23   : > { %p2404_p1 = pneg %p2388_p13 }
  0x26   : > { %s1951_s16 = scalar_lea.hbm %s2831_s6, 16 }
  0x27   : > { %p1952_p0 = scmp.ne.s32.totalorder %s2831_s6, %s1951_s16  ;;  %p1958_p7 = scmp.lt.u32.totalorder %s1951_s16, %s2831_s6 }
  0x29   : > { %p1954_p3 = pnand %p2404_p1, %p1952_p0 }
  0x2b   : > { %p1955_p4 = pneg %p1954_p3 }
  0x2d   : > { %p1960_p8 = pnand %p1958_p7, %p1955_p4 }
  0x2f   : > { %1963 = shalt.err (!%p1960_p8)
}
  0x30   : > { %s1964_s24 = scalar_lea.vmem %s430_s17, 16  ;;  %s1971_s18 = scalar_lea.vmem %s430_s17, 32 }
  0x31   : > { %p1965_p12 = scmp.ne.s32.totalorder %s430_s17, %s1964_s24  ;;  %p1972_p10 = scmp.lt.s32.totalorder %s430_s17, %s430_s17 }
  0x32   : > { %p1973_p6 = scmp.lt.s32.totalorder %s1971_s18, %s1964_s24 }
  0x33   : > { %p1967_p2 = pnand %p1965_p12, %p2404_p1 }
  0x34   : > { %p1974_p5 = por %p1973_p6, %p1972_p10 }
  0x35   : > { %p1968_p9 = pneg %p1967_p2 }
  0x37   : > { %p1975_p11 = pnand %p1974_p5, %p1968_p9 }
  0x39   : > { %1978 = shalt.err (!%p1975_p11)
}
  0x3a   : > { %1849 = dma.hbm_to_vmem [thread:$0]  (!%p2388_p13), %s2831_s6, 16, %s430_s17, [#allocation7]  }
  0x3b   : > { %s1979_s27 = scalar_lea.hbm %s2794_s8, 16 }
  0x3c   : > { %p1980_p2 = scmp.ne.s32.totalorder %s2794_s8, %s1979_s27  ;;  %p1986_p5 = scmp.lt.u32.totalorder %s1979_s27, %s2794_s8 }
  0x3e   : > { %p1982_p0 = pnand %p1980_p2, %p2404_p1 }
  0x40   : > { %p1983_p6 = pneg %p1982_p0 }
  0x42   : > { %p1988_p9 = pnand %p1986_p5, %p1983_p6 }
  0x44   : > { %1991 = shalt.err (!%p1988_p9)
}
  0x45   : > { %s1992_s17 = scalar_lea.vmem %s2392_s26, 16  ;;  %s1999_s12 = scalar_lea.vmem %s2392_s26, 32 }
  0x46   : > { %p1993_p10 = scmp.ne.s32.totalorder %s2392_s26, %s1992_s17  ;;  %p2000_p4 = scmp.lt.s32.totalorder %s2392_s26, %s2392_s26 }
  0x47   : > { %p2001_p7 = scmp.lt.s32.totalorder %s1999_s12, %s1992_s17 }
  0x48   : > { %p1995_p11 = pnand %p1993_p10, %p2404_p1 }
  0x49   : > { %p2002_p8 = por %p2001_p7, %p2000_p4 }
  0x4a   : > { %p1996_p3 = pneg %p1995_p11 }
  0x4c   : > { %p2003_p12 = pnand %p2002_p8, %p1996_p3 }
  0x4e   : > { %2006 = shalt.err (!%p2003_p12)
}
  0x4f   : > { %1855 = dma.hbm_to_vmem [thread:$0]  (!%p2388_p13), %s2794_s8, 16, %s2392_s26, [#allocation10]  }
  0x50   : > { %s2833_s3 = sld [smem:[#allocation28_spill]] }
  0x56   : > { %s2007_s16 = scalar_lea.hbm %s2833_s3, 64 }
  0x57   : > { %p2008_p2 = scmp.ne.s32.totalorder %s2833_s3, %s2007_s16  ;;  %p2014_p5 = scmp.lt.u32.totalorder %s2007_s16, %s2833_s3 }
  0x59   : > { %p2010_p0 = pnand %p2008_p2, %p2404_p1 }
  0x5b   : > { %p2011_p6 = pneg %p2010_p0 }
  0x5d   : > { %p2016_p9 = pnand %p2014_p5, %p2011_p6 }
  0x5f   : > { %2019 = shalt.err (!%p2016_p9)
}
  0x60   : > { %s2020_s26 = scalar_lea.vmem %s2394_s20, 64  ;;  %p2028_p4 = scmp.lt.s32.totalorder %s2394_s20, %s2394_s20 }
  0x61   : > { %p2021_p10 = scmp.ne.s32.totalorder %s2394_s20, %s2020_s26  ;;  %p2029_p7 = scmp.lt.s32.totalorder %s2020_s26, %s2020_s26 }
  0x63   : > { %p2023_p11 = pnand %p2021_p10, %p2404_p1  ;;  %p2030_p8 = por %p2029_p7, %p2028_p4 }
  0x65   : > { %p2024_p3 = pneg %p2023_p11 }
  0x67   : > { %p2031_p12 = pnand %p2030_p8, %p2024_p3 }
  0x69   : > { %2034 = shalt.err (!%p2031_p12)
}
  0x6a   : > { %1846 = dma.hbm_to_vmem [thread:$0]  (!%p2388_p13), %s2833_s3, 64, %s2394_s20, [#allocation4]  }
  0x6b   : > { %s2232_s21 = smov [#allocation8]   ;;  %s2035_s27 = scalar_lea.hbm %s2793_s7, 512 }
  0x6c   : > { %s439_s29 = sshll.u32 %s2232_s21, 4  ;;  %p2036_p2 = scmp.ne.s32.totalorder %s2793_s7, %s2035_s27  ;;  %s440_s29 = int_to_ptr.vmem [resolvable:$true] %s439_s29 }
  0x6d   : > { %p2042_p5 = scmp.lt.u32.totalorder %s2035_s27, %s2793_s7 }
  0x6e   : > { %p2038_p0 = pnand %p2036_p2, %p2404_p1 }
  0x70   : > { %p2039_p6 = pneg %p2038_p0 }
  0x72   : > { %p2044_p9 = pnand %p2042_p5, %p2039_p6 }
  0x74   : > { %2047 = shalt.err (!%p2044_p9)
}
  0x75   : > { %s2048_s20 = scalar_lea.vmem %s440_s29, 512  ;;  %p2056_p4 = scmp.lt.s32.totalorder %s440_s29, %s440_s29 }
  0x76   : > { %p2049_p10 = scmp.ne.s32.totalorder %s440_s29, %s2048_s20  ;;  %p2057_p7 = scmp.lt.s32.totalorder %s2048_s20, %s2048_s20 }
  0x78   : > { %p2051_p11 = pnand %p2049_p10, %p2404_p1  ;;  %p2058_p8 = por %p2057_p7, %p2056_p4 }
  0x7a   : > { %p2052_p3 = pneg %p2051_p11 }
  0x7c   : > { %p2059_p12 = pnand %p2058_p8, %p2052_p3 }
  0x7e   : > { %2062 = shalt.err (!%p2059_p12)
}
  0x7f   : > { %s2233_s12 = smov 128   ;;  %s2234_s14 = smov 8  }
  0x80   : > { %1852 = dma.hbm_to_vmem [thread:$0]  (!%p2388_p13), %s2793_s7, 512, %s440_s29, [#allocation7], %s2233_s12, %s2233_s12, %s2234_s14  }
  0x81   : > { %s2235_s16 = smov [#allocation11]   ;;  %s2063_s17 = scalar_lea.hbm %s2797_s11, 512 }
  0x82   : > { %s469_s27 = sshll.u32 %s2235_s16, 4  ;;  %p2064_p2 = scmp.ne.s32.totalorder %s2797_s11, %s2063_s17  ;;  %s470_s27 = int_to_ptr.vmem [resolvable:$true] %s469_s27 }
  0x83   : > { %p2070_p5 = scmp.lt.u32.totalorder %s2063_s17, %s2797_s11 }
  0x84   : > { %p2066_p0 = pnand %p2064_p2, %p2404_p1 }
  0x86   : > { %p2067_p6 = pneg %p2066_p0 }
  0x88   : > { %p2072_p9 = pnand %p2070_p5, %p2067_p6 }
  0x8a   : > { %2075 = shalt.err (!%p2072_p9)
}
  0x8b   : > { %s2076_s29 = scalar_lea.vmem %s470_s27, 512  ;;  %p2084_p4 = scmp.lt.s32.totalorder %s470_s27, %s470_s27 }
  0x8c   : > { %p2077_p10 = scmp.ne.s32.totalorder %s470_s27, %s2076_s29  ;;  %p2085_p7 = scmp.lt.s32.totalorder %s2076_s29, %s2076_s29 }
  0x8e   : > { %p2079_p11 = pnand %p2077_p10, %p2404_p1  ;;  %p2086_p8 = por %p2085_p7, %p2084_p4 }
  0x90   : > { %p2080_p3 = pneg %p2079_p11 }
  0x92   : > { %p2087_p12 = pnand %p2086_p8, %p2080_p3 }
  0x94   : > { %2090 = shalt.err (!%p2087_p12)
}
  0x95   : > { %1858 = dma.hbm_to_vmem [thread:$0]  (!%p2388_p13), %s2797_s11, 512, %s470_s27, [#allocation10], %s2233_s12, %s2233_s12, %s2234_s14  }
  0x96   : > { %p2834_p2 = scmp.ne.s32.totalorder %s2829_s30, 0 }
  0x97   : > { %p2835_p0 = scmp.eq.s32.totalorder (!%p2834_p2), %s2347_s22, 0 }
  0x98   : > { %502 = sbr.rel (%p2834_p2) target bundleno = 3800 (0xed8), region = 72 }
  0x9f   : > { %2190 = dma.done.wait (%p2835_p0), [#allocation4], 64   ;;  %p2836_p1 = pmov %p2835_p0 }
  0xa0   : > { %p2837_p6 = pmov %p2835_p0 }
  0xa1   : > { %2192 = vsyncadd (%p2836_p1), [#allocation4], 4294967232 }
  0xa2   : > { %2194 = dma.done.wait (%p2837_p6), [#allocation7], 528   ;;  %p2838_p5 = pmov %p2835_p0 }
  0xa3   : > { %p2839_p9 = pmov %p2835_p0 }
  0xa4   : > { %2196 = vsyncadd (%p2838_p5), [#allocation7], 4294966768 }
  0xa5   : > { %2198 = dma.done.wait (%p2839_p9), [#allocation10], 528   ;;  %p2840_p13 = pmov %p2835_p0 }
  0xa6   : > { %s562_s3 = sand.u32 1, %s2219_s19   ;;  %p574_p10 = scmp.lt.s32.totalorder %s2347_s22, 1 }
  0xa7   : > { %2200 = vsyncadd (%p2840_p13), [#allocation10], 4294966768  ;;  %s2521_s6 = sshll.u32 %s562_s3, 3  ;;  %p2841_p11 = scmp.ne.s32.totalorder %s2347_s22, 0 }
  0xa8   : > { %s575_s23 = scalar_select %p574_p10, %s2347_s22, 1 }
  0xa9   : > { %s2531_s18 = scalar_lea.vmem [#allocation12], %s2521_s6  ;;  %s571_s17 = scalar_lea.vmem [#allocation13], %s2521_s6  ;;  %v586_v0 = vld [vmem:[%s2788_s2] sm:$0x3] (!%p2841_p11)  ;;  %vm587_vm0 = vcmask (!%p2841_p11), 254976  }
  0xaa   : > { %s1625_s30 = sshll.u32 %s575_s23, 3  ;;  %585 = sbr.rel (%p2841_p11) target bundleno = 177 (0xb1), region = 96  ;;  %588 = vst.msk [vmem:[#allocation2] sm:$0x3] (!%p2841_p11), %vm587_vm0, %v586_v0 }
  0xab   : > { %s577_s14 = scalar_lea.vmem %s2786_s0, %s1625_s30  ;;  %s581_s24 = scalar_lea.vmem %s2787_s1, %s1625_s30 }
  0xb1 PF: > { %v681_v1 = vld [vmem:[%s581_s24] sm:$0xff]  ;;  %v677_v3 = vld [vmem:[%s2790_s4 + $0x8] sm:$0xff]  ;;  %v2236_v4 = vmov 0   ;;  %v2237_v5 = vmov 0.0|0.0   ;;  %v678_v7 = vld [vmem:[%s2790_s4 + $0x10] sm:$0xff]  ;;  %v2238_v9 = vmov 0.0  }
  0xb2   : > { %v676_v2 = vld [vmem:[%s2790_s4] sm:$0xff]  ;;  %1926 = vset.pattern.permute.xlu0 %v2236_v4  ;;  %1773 = vmatprep.subr.bf16.mxu1 %v2237_v5  ;;  %v679_v8 = vld [vmem:[%s2790_s4 + $0x18] sm:$0xff]  ;;  %v590_v10 = vld [vmem:[#allocation3] sm:$0xf]  ;;  %vm602_vm1 = vcmask 1043456   ;;  %vm598_vm2 = vcmask 31744  }
  0xb3   : > { %v2546_v6 = vpack.c.bf16 %v677_v3, %v676_v2  ;;  %685 = vperm.xlu0 %1926, %v681_v1   ;;  %1691 = vmatprep.subr.mxu0 %v2238_v9  ;;  %v589_v11 = vld [vmem:[%s577_s14] sm:$0xff]  ;;  %v2556_v12 = vpack.c.bf16 %v679_v8, %v678_v7  ;;  %vm2239_vm3 = vmmov 0   ;;  %v682_v13 = vld [vmem:[#allocation2] sm:$0x3]  ;;  %vm695_vm4 = vcmask 261120   ;;  %s2240_s14 = smov 64  }
  0xb4   : > { %1692 = vmatpush3.msk.msra.mxu0 %vm602_vm1, %v590_v10  ;;  %1693 = vmatprep.mubr.msk.f32.mxu0 %vm2239_vm3, %v2238_v9  ;;  %v2579_v18 = vld [vmem:[#allocation6] ss:$0 sm:$0xff]  ;;  %s2241_s27 = smov 32   ;;  %v1628_v22 = vld [vmem:[%s2791_s5] ss:$0 sm:$0xff]  ;;  %s2242_s20 = smov 96  }
  0xb5   : > { %1775 = vmatpush3.bf16.msra.mxu1 %v2546_v6  ;;  %1704 = vmatprep.mubr.msk.f32.mxu1 %vm2239_vm3, %v2238_v9  ;;  %vm802_vm5 = vcmask 254976   ;;  %vm1029_vm6 = vcmask 259076   ;;  %vm916_vm7 = vcmask 257026   ;;  %vm1142_vm8 = vcmask 261126   ;;  %s1648_s24 = sshll.u32 %s2347_s22, 7  ;;  %s1422_s21 = sshll.u32 %s2531_s18, 4  ;;  %s1423_s21 = int_to_ptr.vmem [resolvable:$true] %s1422_s21 }
  0xb6   : > { %1776 = vmatprep.subr.bf16.mxu1 %v2237_v5  ;;  %1694 = vmatmul.mubr.msk.f32.vlgmr.msra.gmra.mrb[0].mxu0 %vm598_vm2, %v589_v11  ;;  %s2678_s29 = scalar_lea.hbm %s2799_s13, %s1648_s24  ;;  %s1404_s15 = scalar_lea.sflag [#allocation5], %s562_s3 }
  0xb7   : > { %1779 = vmatprep.subr.bf16.mxu0 %v2237_v5  ;;  %1715 = vmatprep.mubr.msk.f32.mxu0 %vm2239_vm3, %v2238_v9  ;;  %s2091_s23 = scalar_lea.vmem %s1423_s21, 128  ;;  %p2842_p4 = scmp.ne.s32.totalorder %s2826_s28, 0 }
  0xb8   : > { %1781 = vmatpush3.bf16.msra.mxu0 %v2546_v6  ;;  %p2092_p3 = scmp.ne.s32.totalorder %s1423_s21, %s2091_s23  ;;  %s2243_s30 = smov [#allocation12]  }
  0xb9   : > { %1778 = vmatpush3.bf16.msra.mxu1 %v2556_v12  ;;  %1782 = vmatprep.subr.bf16.mxu0 %v2237_v5  ;;  %s2095_s25 = sshll.u32 %s2243_s30, 4  ;;  %s2096_s25 = int_to_ptr.vmem [resolvable:$false] %s2095_s25 }
  0xba   : > { %1785 = vmatprep.subr.bf16.mxu1 %v2237_v5  ;;  %p2093_p7 = pnand %p2092_p3, %p2842_p4  ;;  %s2097_s12 = scalar_lea.vmem %s2096_s25, 256 }
  0xbb   : > { %p2098_p12 = scmp.lt.s32.totalorder %s1423_s21, %s2096_s25  ;;  %p2099_p2 = scmp.lt.s32.totalorder %s2097_s12, %s2091_s23 }
  0xbc   : > { %1784 = vmatpush3.bf16.msra.mxu0 %v2556_v12  ;;  %p2094_p8 = pneg %p2093_p7 }
  0xbd   : > { %1791 = vmatprep.subr.bf16.mxu0 %v2237_v5  ;;  %p2100_p0 = por %p2099_p2, %p2098_p12 }
  0xbf   : > { %p2101_p1 = pnand %p2100_p0, %p2094_p8 }
 0x132   : > { %v686_v14 = vpop.permute.xlu0 %685 }
 0x133   : > { %v688_v15 = vmul.f32 %v686_v14, %v682_v13  ;;  %v2592_v39 = vrot.slane %v686_v14, 2 }
 0x135   : > { %1705 = vmatmul.mubr.msk.f32.vlgmr.msra.gmra.mrb[0].mxu1 %vm695_vm4, %v688_v15 }
 0x136   : > { %1787 = vmatpush3.bf16.msra.mxu1 %v2546_v6  ;;  %1726 = vmatprep.mubr.msk.f32.mxu1 %vm2239_vm3, %v2238_v9 }
 0x137   : > { %1788 = vmatprep.subr.bf16.mxu1 %v2237_v5 }
 0x13a   : > { %1790 = vmatpush3.bf16.msra.mxu1 %v2556_v12 }
 0x13b   : > { %1797 = vmatprep.subr.bf16.mxu1 %v2237_v5 }
 0x189   : > { %v672_v16 = vpop.f32.mrb[0].mxu0 }
 0x18a   : > { %v1695_v17 = vpop.f32.mrb[1].mxu0  ;;  %v2586_v23 = vadd.f32 %v1628_v22, %v672_v16 }
 0x208   : > { %v765_v19 = vpop.f32.mrb[0].mxu1 }
 0x209   : > { %v766_v20 = vadd.f32 %v2579_v18, %v765_v19  ;;  %v1706_v21 = vpop.f32.mrb[1].mxu1 }
 0x20b   : > { %777 = vrot.lane.b32.xlu0 %v766_v20, %s2240_s14  ;;  %v769_v24 = vadd.f32 %v766_v20, %v2586_v23 }
 0x20d   : > { %v1633_v25 = vmul.f32 -1.442695, %v769_v24 }
 0x20f   : > { %793 = vrot.lane.b32.xlu0 %v688_v15, %s2241_s27  ;;  %1927 = vpow2.f32 %v1633_v25 }
 0x219   : > { %v1928_v26 = vpop.eup %1927 }
 0x21a   : > { %v773_v27 = vadd.f32 1.0, %v1928_v26 }
 0x21c   : > { %1929 = vrcp.f32 %v773_v27 }
 0x226   : > { %v1930_v28 = vpop.eup %1929 }
 0x227   : > { %v787_v35 = vsub.f32 1.0, %v1930_v28 }
 0x27d   : > { %v778_v29 = vpop.permute.xlu0 %777 }
 0x27e   : > { %v780_v30 = vmul.f32 %v1930_v28, %v778_v29 }
 0x280   : > { %782 = vrot.lane.b32.xlu1 %v780_v30, %s2240_s14 }
 0x281   : > { %v794_v34 = vpop.permute.xlu0 %793 }
 0x282   : > { %v796_v37 = vmul.f32 %v1930_v28, %v794_v34 }
 0x2f2   : > { %v783_v31 = vpop.permute.xlu1 %782 }
 0x2f3   : > { %v785_v32 = vadd.f32 %v783_v31, %v2586_v23 }
 0x2f5   : > { %1931 = vtanh.f32 %v785_v32 }
 0x2ff   : > { %v1932_v33 = vpop.eup %1931 }
 0x300   : > { %789 = vrot.lane.b32.xlu1 %v1932_v33, %s2242_s20 }
 0x372   : > { %v790_v36 = vpop.permute.xlu1 %789 }
 0x373   : > { %v792_v38 = vmul.f32 %v790_v36, %v787_v35 }
 0x375   : > { %v2594_v40 = vadd.f32 %v796_v37, %v792_v38 }
 0x377   : > { %v806_v41 = vmul.f32 %v2592_v39, %v2594_v40 }
 0x379   : > { %808 = vrot.lane.b32.xlu1 %v806_v41, %s2242_s20  ;;  %v908_v57 = vrot.slane %v806_v41, 6 }
 0x3eb   : > { %v809_v42 = vpop.permute.xlu1 %808 }
 0x3ec   : > { %1716 = vmatmul.mubr.msk.f32.vlgmr.msra.gmra.mrb[2].mxu0 %vm695_vm4, %v809_v42 }
 0x3ed   : > { %1793 = vmatpush3.bf16.msra.mxu0 %v2546_v6  ;;  %1737 = vmatprep.mubr.msk.f32.mxu0 %vm2239_vm3, %v2238_v9 }
 0x3ee   : > { %1794 = vmatprep.subr.bf16.mxu0 %v2237_v5 }
 0x3f1   : > { %1796 = vmatpush3.bf16.msra.mxu0 %v2556_v12 }
 0x3f2   : > { %1803 = vmatprep.subr.bf16.mxu0 %v2237_v5 }
 0x4bf   : > { %v878_v43 = vpop.f32.mrb[2].mxu0 }
 0x4c0   : > { %v879_v44 = vadd.f32 %v2579_v18, %v878_v43  ;;  %v1717_v45 = vpop.f32.mrb[3].mxu0 }
 0x4c1   : > { %v1148_v45 = vld [vmem:[#allocation8] sm:$0xff] }
 0x4c2   : > { %v883_v46 = vrot.slane %v879_v44, 6 }
 0x4c4   : > { %892 = vrot.lane.b32.xlu0 %v883_v46, %s2240_s14  ;;  %v885_v47 = vadd.f32 %v883_v46, %v2586_v23  ;;  %v1150_v46 = vld [vmem:[#allocation8 + $0x10] sm:$0xff] }
 0x4c6   : > { %v1635_v48 = vmul.f32 -1.442695, %v885_v47 }
 0x4c8   : > { %1933 = vpow2.f32 %v1635_v48  ;;  %v1151_v48 = vld [vmem:[#allocation8 + $0x18] sm:$0xff] }
 0x4d2   : > { %v1934_v49 = vpop.eup %1933 }
 0x4d3   : > { %v889_v50 = vadd.f32 1.0, %v1934_v49 }
 0x4d5   : > { %1935 = vrcp.f32 %v889_v50 }
 0x4df   : > { %v1936_v51 = vpop.eup %1935 }
 0x4e0   : > { %v902_v58 = vsub.f32 1.0, %v1936_v51  ;;  %v910_v60 = vmul.f32 %v1936_v51, %v908_v57 }
 0x536   : > { %v893_v52 = vpop.permute.xlu0 %892 }
 0x537   : > { %v895_v53 = vmul.f32 %v1936_v51, %v893_v52 }
 0x539   : > { %897 = vrot.lane.b32.xlu1 %v895_v53, %s2240_s14 }
 0x5ab   : > { %v898_v54 = vpop.permute.xlu1 %897 }
 0x5ac   : > { %v900_v55 = vadd.f32 %v898_v54, %v2586_v23  ;;  %v1233_v54 = vld [vmem:[%s2795_s9] sm:$0xff] }
 0x5ae   : > { %1937 = vtanh.f32 %v900_v55  ;;  %v1234_v55 = vld [vmem:[%s2795_s9 + $0x8] sm:$0xff] }
 0x5af   : > { %v1804_v57 = vpack.c.bf16 %v1234_v55, %v1233_v54 }
 0x5b8   : > { %v1938_v56 = vpop.eup %1937 }
 0x5b9   : > { %904 = vrot.lane.b32.xlu0 %v1938_v56, %s2242_s20 }
 0x62b   : > { %v905_v59 = vpop.permute.xlu0 %904 }
 0x62c   : > { %v907_v61 = vmul.f32 %v905_v59, %v902_v58 }
 0x62e   : > { %v2612_v62 = vadd.f32 %v910_v60, %v907_v61 }
 0x630   : > { %v918_v63 = vmul.f32 %v2612_v62, %v2592_v39 }
 0x632   : > { %v920_v0 = vrot.slane %v918_v63, 2  ;;  %v1021_v20 = vrot.slane %v918_v63, 6  ;;  %v1236_v63 = vld [vmem:[%s2795_s9 + $0x18] sm:$0xff] }
 0x634   : > { %921 = vrot.lane.b32.xlu1 %v920_v0, %s2242_s20 }
 0x6a6   : > { %v922_v1 = vpop.permute.xlu1 %921 }
 0x6a7   : > { %1727 = vmatmul.mubr.msk.f32.vlgmr.msra.gmra.mrb[2].mxu1 %vm695_vm4, %v922_v1  ;;  %v1318_v1 = vld [vmem:[#allocation11] sm:$0xff] }
 0x6a8   : > { %1748 = vmatprep.mubr.msk.f32.mxu1 %vm2239_vm3, %v2238_v9 }
 0x77a   : > { %v991_v2 = vpop.f32.mrb[2].mxu1 }
 0x77b   : > { %v992_v3 = vadd.f32 %v2579_v18, %v991_v2  ;;  %v1728_v4 = vpop.f32.mrb[3].mxu1  ;;  %v1319_v2 = vld [vmem:[#allocation11 + $0x8] sm:$0xff] }
 0x77c   : > { %v1640_v4 = vld [vmem:[#allocation9] ss:$0 sm:$0xff] }
 0x77d   : > { %v996_v6 = vrot.slane %v992_v3, 4  ;;  %v1810_v3 = vpack.c.bf16 %v1319_v2, %v1318_v1 }
 0x77f   : > { %1005 = vrot.lane.b32.xlu0 %v996_v6, %s2240_s14  ;;  %v998_v7 = vadd.f32 %v996_v6, %v2586_v23 }
 0x781   : > { %v1637_v8 = vmul.f32 -1.442695, %v998_v7 }
 0x783   : > { %1939 = vpow2.f32 %v1637_v8 }
 0x78d   : > { %v1940_v10 = vpop.eup %1939 }
 0x78e   : > { %v1002_v11 = vadd.f32 1.0, %v1940_v10  ;;  %v1320_v10 = vld [vmem:[#allocation11 + $0x10] sm:$0xff] }
 0x790   : > { %1941 = vrcp.f32 %v1002_v11  ;;  %v1321_v11 = vld [vmem:[#allocation11 + $0x18] sm:$0xff] }
 0x79a   : > { %v1942_v12 = vpop.eup %1941 }
 0x79b   : > { %v1015_v19 = vsub.f32 1.0, %v1942_v12  ;;  %v1023_v22 = vmul.f32 %v1942_v12, %v1021_v20 }
 0x7f1   : > { %v1006_v13 = vpop.permute.xlu0 %1005 }
 0x7f2   : > { %v1008_v14 = vmul.f32 %v1942_v12, %v1006_v13  ;;  %v1813_v12 = vpack.c.bf16 %v1321_v11, %v1320_v10 }
 0x7f4   : > { %1010 = vrot.lane.b32.xlu1 %v1008_v14, %s2240_s14 }
 0x866   : > { %v1011_v15 = vpop.permute.xlu1 %1010 }
 0x867   : > { %v1013_v16 = vadd.f32 %v1011_v15, %v2586_v23 }
 0x869   : > { %1943 = vtanh.f32 %v1013_v16 }
 0x873   : > { %v1944_v17 = vpop.eup %1943 }
 0x874   : > { %1017 = vrot.lane.b32.xlu0 %v1944_v17, %s2242_s20 }
 0x8e6   : > { %v1018_v21 = vpop.permute.xlu0 %1017 }
 0x8e7   : > { %v1020_v24 = vmul.f32 %v1018_v21, %v1015_v19 }
 0x8e9   : > { %v1024_v25 = vadd.f32 %v1023_v22, %v1020_v24 }
 0x8eb   : > { %v1031_v26 = vmul.f32 %v1024_v25, %v2592_v39 }
 0x8ed   : > { %v1033_v27 = vrot.slane %v1031_v26, 4  ;;  %v1134_v50 = vrot.slane %v1031_v26, 6 }
 0x8ef   : > { %1034 = vrot.lane.b32.xlu1 %v1033_v27, %s2242_s20 }
 0x961   : > { %v1035_v28 = vpop.permute.xlu1 %1034 }
 0x962   : > { %1738 = vmatmul.mubr.msk.f32.vlgmr.msra.gmra.mrb[4].mxu0 %vm695_vm4, %v1035_v28 }
 0x963   : > { %1759 = vmatprep.mubr.msk.f32.mxu0 %vm2239_vm3, %v2238_v9  ;;  %1805 = vmatpush3.bf16.msra.mxu0 %v1804_v57 }
 0x964   : > { %1806 = vmatprep.subr.bf16.mxu0 %v2237_v5 }
 0xa35   : > { %v1104_v29 = vpop.f32.mrb[4].mxu0 }
 0xa36   : > { %v1105_v30 = vadd.f32 %v2579_v18, %v1104_v29  ;;  %v1739_v31 = vpop.f32.mrb[5].mxu0 }
 0xa38   : > { %v1109_v32 = vrot.slane %v1105_v30, 2 }
 0xa3a   : > { %1118 = vrot.lane.b32.xlu0 %v1109_v32, %s2240_s14  ;;  %v1111_v33 = vadd.f32 %v1109_v32, %v2586_v23 }
 0xa3c   : > { %v1639_v34 = vmul.f32 -1.442695, %v1111_v33 }
 0xa3e   : > { %1945 = vpow2.f32 %v1639_v34 }
 0xa48   : > { %v1946_v35 = vpop.eup %1945 }
 0xa49   : > { %v1115_v36 = vadd.f32 1.0, %v1946_v35 }
 0xa4b   : > { %1947 = vrcp.f32 %v1115_v36 }
 0xa55   : > { %v1948_v37 = vpop.eup %1947 }
 0xa56   : > { %v1128_v49 = vsub.f32 1.0, %v1948_v37  ;;  %v1136_v52 = vmul.f32 %v1948_v37, %v1134_v50 }
 0xaac   : > { %v1119_v38 = vpop.permute.xlu0 %1118 }
 0xaad   : > { %v1121_v39 = vmul.f32 %v1948_v37, %v1119_v38 }
 0xaaf   : > { %1123 = vrot.lane.b32.xlu1 %v1121_v39, %s2240_s14 }
 0xab3   : > { %799 = vrot.lane.b32.xlu1 %v2594_v40, %s2242_s20  ;;  %v1149_v40 = vld [vmem:[#allocation8 + $0x8] sm:$0xff] }
 0xab4   : > { %v1798_v47 = vpack.c.bf16 %v1149_v40, %v1148_v45 }
 0xab6   : > { %1799 = vmatpush3.bf16.msra.mxu1 %v1798_v47 }
 0xab7   : > { %1026 = vrot.lane.b32.xlu1 %v1024_v25, %s2242_s20  ;;  %1800 = vmatprep.subr.bf16.mxu1 %v2237_v5 }
 0xb21   : > { %v1124_v18 = vpop.permute.xlu1 %1123 }
 0xb22   : > { %v1126_v41 = vadd.f32 %v1124_v18, %v2586_v23  ;;  %v1801_v23 = vpack.c.bf16 %v1151_v48, %v1150_v46 }
 0xb24   : > { %1949 = vtanh.f32 %v1126_v41  ;;  %1802 = vmatpush3.bf16.msra.mxu1 %v1801_v23 }
 0xb25   : > { %v800_v42 = vpop.permute.xlu1 %799  ;;  %1809 = vmatprep.subr.bf16.mxu1 %v2237_v5 }
 0xb26   : > { %803 = vst.msk [vmem:[%s2531_s18] sm:$0x3] %vm802_vm5, %v800_v42 }
 0xb29   : > { %v1027_v43 = vpop.permute.xlu1 %1026 }
 0xb2a   : > { %1030 = vst.msk [vmem:[%s2531_s18] sm:$0x30] %vm1029_vm6, %v1027_v43 }
 0xb2e   : > { %v1950_v44 = vpop.eup %1949 }
 0xb2f   : > { %1130 = vrot.lane.b32.xlu0 %v1950_v44, %s2242_s20 }
 0xb33   : > { %913 = vrot.lane.b32.xlu0 %v2612_v62, %s2242_s20  ;;  %v1235_v62 = vld [vmem:[%s2795_s9 + $0x10] sm:$0xff] }
 0xb34   : > { %v1807_v0 = vpack.c.bf16 %v1236_v63, %v1235_v62 }
 0xb36   : > { %1808 = vmatpush3.bf16.msra.mxu0 %v1807_v0 }
 0xba1   : > { %v1131_v51 = vpop.permute.xlu0 %1130 }
 0xba2   : > { %v1133_v53 = vmul.f32 %v1131_v51, %v1128_v49 }
 0xba4   : > { %v1137_v56 = vadd.f32 %v1136_v52, %v1133_v53 }
 0xba5   : > { %v914_v58 = vpop.permute.xlu0 %913 }
 0xba6   : > { %917 = vst.msk [vmem:[%s2531_s18] sm:$0xc] %vm916_vm7, %v914_v58  ;;  %1139 = vrot.lane.b32.xlu0 %v1137_v56, %s2242_s20 }
 0xc18   : > { %v1140_v59 = vpop.permute.xlu0 %1139 }
 0xc19   : > { %1143 = vst.msk [vmem:[%s2531_s18] sm:$0xc0] %vm1142_vm8, %v1140_v59  ;;  %1144 = vst.msk [vmem:[#allocation2 - $0x6] sm:$0xc0] %vm1142_vm8, %v1140_v59 }
 0xc1a   : > { %1145 = vst.msk [vmem:[#allocation15 - $0x6] sm:$0xc0] %vm1142_vm8, %v1140_v59 }
 0xc20   : > { %v1146_v60 = vld [vmem:[%s2531_s18] sm:$0xff] }
 0xc21   : > { %v1147_v61 = vmax.f32 %v1146_v60, 0.0 }
 0xc23   : > { %1749 = vmatmul.mubr.msk.f32.vlgmr.msra.gmra.mrb[4].mxu1 %vm695_vm4, %v1147_v61 }
 0xc24   : > { %1770 = vmatprep.mubr.msk.f32.mxu1 %vm2239_vm3, %v2238_v9  ;;  %1811 = vmatpush3.bf16.msra.mxu1 %v1810_v3 }
 0xc25   : > { %1812 = vmatprep.subr.bf16.mxu1 %v2237_v5  ;;  %v1642_v5 = vld [vmem:[%s2796_s10] ss:$0 sm:$0xff] }
 0xc28   : > { %1814 = vmatpush3.bf16.msra.mxu1 %v1813_v12 }
 0xcf6   : > { %v1228_v6 = vpop.f32.mrb[4].mxu1 }
 0xcf7   : > { %v1229_v9 = vadd.f32 %v1640_v4, %v1228_v6  ;;  %v1750_v7 = vpop.f32.mrb[5].mxu1 }
 0xcf9   : > { %v1232_v8 = vmax.f32 %v1229_v9, 0.0 }
 0xcfb   : > { %1760 = vmatmul.mubr.msk.f32.vlgmr.msra.gmra.mrb[6].mxu0 %vm695_vm4, %v1232_v8 }
 0xdce   : > { %v1313_v13 = vpop.f32.mrb[6].mxu0 }
 0xdcf   : > { %v1314_v14 = vadd.f32 %v1642_v5, %v1313_v13  ;;  %v1761_v15 = vpop.f32.mrb[7].mxu0 }
 0xdd1   : > { %v1317_v16 = vmax.f32 %v1314_v14, 0.0 }
 0xdd3   : > { %1771 = vmatmul.mubr.msk.f32.vlgmr.msra.gmra.mrb[6].mxu1 %vm695_vm4, %v1317_v16 }
 0xdd4   : > { %2104 = shalt.err (!%p2101_p1)
}
 0xdd5   : > { %s2105_s3 = scalar_lea.hbm %s2678_s29, 128  ;;  %s2109_s14 = scalar_lea.hbm %s2799_s13, 256 }
 0xdd6   : > { %p2106_p6 = scmp.ne.s32.totalorder %s2678_s29, %s2105_s3  ;;  %p2110_p13 = scmp.lt.u32.totalorder %s2678_s29, %s2799_s13 }
 0xdd7   : > { %p2111_p10 = scmp.lt.u32.totalorder %s2109_s14, %s2105_s3  ;;  %p2113_p3 = scmp.lt.u32.totalorder %s2105_s3, %s2678_s29 }
 0xdd8   : > { %p2107_p5 = pnand %p2106_p6, %p2842_p4 }
 0xdd9   : > { %p2112_p11 = por %p2111_p10, %p2110_p13 }
 0xdda   : > { %p2108_p9 = pneg %p2107_p5 }
 0xddb   : > { %p2114_p7 = por %p2113_p3, %p2112_p11 }
 0xddd   : > { %p2115_p8 = pnand %p2114_p7, %p2108_p9 }
 0xddf   : > { %2118 = shalt.err (!%p2115_p8)
}
 0xde0   : > { %1835 = dma.vmem_to_hbm [thread:$0]  (%p2842_p4), %s1423_s21, 128, %s2678_s29, %s1404_s15  }
 0xde1   : > { %s1408_s20 = sand.u32 1, %s2347_s22   ;;  %s2843_s25 = sld [smem:[#allocation30_spill]] }
 0xde2   : > { %s1435_s12 = sshll.u32 %s571_s17, 4  ;;  %s2244_s3 = smov [#allocation15]   ;;  %s2713_s12 = int_to_ptr.vmem [resolvable:$true] %s1435_s12 }
 0xde3   : > { %s1446_s18 = sshll.u32 %s2244_s3, 4  ;;  %s2844_s27 = sld [smem:[#allocation31_spill]]  ;;  %s2715_s18 = int_to_ptr.vmem [resolvable:$true] %s1446_s18 }
 0xde4   : > { %s1409_s29 = scalar_lea.sflag [#allocation14], %s1408_s20  ;;  %s2119_s21 = scalar_lea.vmem %s2713_s12, 128 }
 0xde5   : > { %p2120_p12 = scmp.ne.s32.totalorder %s2713_s12, %s2119_s21  ;;  %s2245_s15 = smov [#allocation13]  }
 0xde6   : > { %s2123_s23 = sshll.u32 %s2245_s15, 4  ;;  %s2124_s23 = int_to_ptr.vmem [resolvable:$false] %s2123_s23 }
 0xde7   : > { %v1644_v17 = vld [vmem:[%s2843_s25] ss:$0 sm:$0xff]  ;;  %p2121_p2 = pnand %p2120_p12, %p2842_p4  ;;  %p2126_p1 = scmp.lt.s32.totalorder %s2713_s12, %s2124_s23 }
 0xde9   : > { %s2711_s26 = scalar_lea.hbm %s2844_s27, %s1648_s24  ;;  %p2122_p0 = pneg %p2121_p2 }
 0xdea   : > { %s2125_s24 = scalar_lea.vmem %s2124_s23, 256 }
 0xdeb   : > { %p2127_p6 = scmp.lt.s32.totalorder %s2125_s24, %s2119_s21 }
 0xded   : > { %p2128_p5 = por %p2127_p6, %p2126_p1 }
 0xdef   : > { %p2129_p9 = pnand %p2128_p5, %p2122_p0 }
 0xea6   : > { %v1398_v19 = vpop.f32.mrb[6].mxu1 }
 0xea7   : > { %v1399_v20 = vadd.f32 %v1644_v17, %v1398_v19  ;;  %v1772_v21 = vpop.f32.mrb[7].mxu1 }
 0xea9   : > { %1402 = vst [vmem:[%s571_s17] sm:$0xff] %v1399_v20 }
 0xeaa   : > { %2132 = shalt.err (!%p2129_p9)
}
 0xeab   : > { %s2133_s6 = scalar_lea.hbm %s2711_s26, 128  ;;  %s2137_s30 = scalar_lea.hbm %s2844_s27, 256 }
 0xeac   : > { %p2134_p13 = scmp.ne.s32.totalorder %s2711_s26, %s2133_s6  ;;  %p2138_p3 = scmp.lt.u32.totalorder %s2711_s26, %s2844_s27 }
 0xead   : > { %p2139_p7 = scmp.lt.u32.totalorder %s2137_s30, %s2133_s6  ;;  %p2141_p12 = scmp.lt.u32.totalorder %s2133_s6, %s2711_s26 }
 0xeae   : > { %p2135_p10 = pnand %p2134_p13, %p2842_p4 }
 0xeaf   : > { %p2140_p8 = por %p2139_p7, %p2138_p3 }
 0xeb0   : > { %p2136_p11 = pneg %p2135_p10 }
 0xeb1   : > { %p2142_p2 = por %p2141_p12, %p2140_p8 }
 0xeb3   : > { %p2143_p0 = pnand %p2142_p2, %p2136_p11 }
 0xeb5   : > { %2146 = shalt.err (!%p2143_p0)
}
 0xeb6   : > { %1836 = dma.vmem_to_hbm [thread:$0]  (%p2842_p4), %s2713_s12, 128, %s2711_s26, %s1409_s29  }
 0xeb7   : > { %s2147_s16 = scalar_lea.vmem %s2715_s18, 32  ;;  %p2845_p6 = scmp.eq.s32.totalorder %s2347_s22, 1 }
 0xeb8   : > { %p2148_p1 = scmp.ne.s32.totalorder %s2715_s18, %s2147_s16  ;;  %p2154_p13 = scmp.lt.s32.totalorder %s2715_s18, %s2715_s18 }
 0xeb9   : > { %p2155_p10 = scmp.lt.s32.totalorder %s2147_s16, %s2147_s16 }
 0xeba   : > { %p2149_p5 = pnand %p2148_p1, %p2845_p6 }
 0xebb   : > { %p2156_p3 = por %p2155_p10, %p2154_p13 }
 0xebc   : > { %p2150_p9 = pneg %p2149_p5 }
 0xebe   : > { %p2157_p11 = pnand %p2156_p3, %p2150_p9 }
 0xec0   : > { %2160 = shalt.err (!%p2157_p11)
}
 0xec1   : > { %s2846_s21 = sld [smem:[#allocation32_spill]]  ;;  %p2848_p7 = pmov %p2845_p6 }
 0xec7   : > { %s2847_s15 = smov %s2846_s21  ;;  %s2161_s23 = scalar_lea.hbm %s2846_s21, 32 }
 0xec8   : > { %p2162_p4 = scmp.ne.s32.totalorder %s2847_s15, %s2161_s23  ;;  %p2167_p2 = scmp.lt.u32.totalorder %s2161_s23, %s2847_s15 }
 0xeca   : > { %p2163_p8 = pnand %p2162_p4, %p2848_p7 }
 0xecc   : > { %p2164_p12 = pneg %p2163_p8 }
 0xece   : > { %p2169_p0 = pnand %p2167_p2, %p2164_p12 }
 0xed0   : > { %2172 = shalt.err (!%p2169_p0)
}
 0xed1   : > { %p2849_p1 = pmov %p2845_p6 }
 0xed3   : > { %1838 = dma.vmem_to_hbm [thread:$0]  (%p2849_p1), %s2715_s18, 32, %s2847_s15, [#allocation14]  }
 0xed4   : > { %p2850_p6 = pmov %p2849_p1 }
 0xed5   : > { %p2851_p5 = pmov %p2849_p1 }
 0xed6   : > { %2202 = dma.done.wait (%p2850_p6), [#allocation14], 32  }
 0xed7   : > { %2204 = vsyncadd (%p2851_p5), [#allocation14], 4294967264 }
 0xed8 PF: > { %s2852_s20 = sld [smem:[#allocation24_spill]]  ;;  %s2853_s30 = sld [smem:[#allocation22_spill]] }
 0xed9   : > { %s2854_s25 = sld [smem:[#allocation27_spill]] }
 0xede   : > { %p1878_p9 = scmp.ge.s32.totalorder %s2852_s20, 2  ;;  %s1462_s3 = sand.u32 1, %s2853_s30  }
 0xedf   : > { %p2855_p13 = scmp.ne.s32.totalorder %s2854_s25, 0  ;;  %s1463_s16 = scalar_lea.sflag [#allocation5], %s1462_s3 }
 0xee1   : > { %p1860_p10 = pnand %p1878_p9, %p2855_p13 }
 0xee3   : > { %2206 = dma.done.wait (!%p1860_p10), %s1463_s16, 128  }
 0xee4   : > { %2208 = vsyncadd (!%p1860_p10), %s1463_s16, 4294967168  ;;  %s2856_s14 = sadd.s32 4294967294, %s2852_s20  }
 0xee5   : > { %s1471_s28 = sand.u32 1, %s2856_s14  }
 0xee6   : > { %s1472_s18 = scalar_lea.sflag [#allocation14], %s1471_s28 }
 0xee7   : > { %2210 = dma.done.wait (!%p1860_p10), %s1472_s18, 128  }
 0xee8   : > { %2212 = vsyncadd (!%p1860_p10), %s1472_s18, 4294967168  ;;  %s2857_s21 = sld [smem:[#allocation25_spill]]  ;;  %s2858_s22 = sld [smem:[#allocation23_spill]] }
 0xee9   : > { %s2859_s20 = sld [smem:[#allocation26_spill]]  ;;  %s2860_s18 = smov %s2219_s19 }
 0xeee   : > { %p32_p3 = scmp.ge.s32.totalorder %s2857_s21, 4   ;;  %s2861_s19 = smov %s2858_s22 }
 0xef0   :  { %34 = sbr.rel (!%p32_p3) target bundleno = 14 (0xe), region = 160 }
 0xef7   :  { %1477 = vsyncpa [#allocation4], 1 }
 0xef8   :  { %1479 = vsyncpa [#allocation4 + $0x1], 1 }
 0xef9   :  { %1480 = vsyncpa [#allocation7], 1 }
 0xefa   :  { %1481 = vsyncpa [#allocation10], 1 }
 0xefb   :  { %1482 = vsyncpa [#allocation5], 1 }
 0xefc   :  { %1484 = vsyncpa [#allocation5 + $0x1], 1 }
 0xefd   :  { %1485 = vsyncpa [#allocation14], 1 }
 0xefe   :  { %1487 = vsyncpa [#allocation14 + $0x1], 1 }

</bundles_post_ra>
